<compile_context>
chip_gen: v6e
topology: v6e:2x2x1
jax: 0.10.0
libtpu: 0.0.40
codegen_flags: <defaults>
</compile_context>

<pallas_src>
import functools

import jax
import jax.numpy as jnp
from jax import lax
from jax.experimental import pallas as pl
from jax.experimental.pallas import tpu as pltpu

LRELU_SLOPE = 0.1
LANE = 128


def get_padding(kernel_size, dilation=1):
    return int((kernel_size * dilation - dilation) / 2)


def _round_up(n, m):
    return ((n + m - 1) // m) * m


def _cdiv(a, b):
    return -(-a // b)


def _vmem_limit(n_f32_elems):
    # generous estimate of per-grid-step VMEM (double-buffered IO + stacks),
    # clamped to stay inside every chip's physical budget (v7x: 64 MiB).
    est = int(n_f32_elems) * 4 * 3 + (8 << 20)
    return int(max(32 << 20, min(est, 48 << 20)))


# ----------------------------------------------------------------------------
# In-kernel helpers (operate on VMEM-resident values).
# ----------------------------------------------------------------------------
def _leaky(x, slope):
    return jnp.where(x >= 0, x, slope * x)


def _pad_lanes(x, left, right):
    c = x.shape[0]
    parts = []
    if left > 0:
        parts.append(jnp.zeros((c, left), x.dtype))
    parts.append(x)
    if right > 0:
        parts.append(jnp.zeros((c, right), x.dtype))
    return jnp.concatenate(parts, axis=1) if len(parts) > 1 else x


def _stack_taps(xp, K, dilation, T_out):
    # (C_in, T_pad) -> (K*C_in, T_out): all K dilated taps stacked on the
    # sublane axis so one MXU matmul covers the whole conv.
    return jnp.concatenate(
        [xp[:, k * dilation:k * dilation + T_out] for k in range(K)], axis=0)


# ----------------------------------------------------------------------------
# Pallas kernel: 'same' dilated Conv1d with fused pre-leaky_relu / post-tanh.
# Weights are pre-flattened to (C_out, K*C_in); bias is (C_out, 1) f32.
# ----------------------------------------------------------------------------
def _conv1d_kernel(x_ref, w_ref, b_ref, o_ref, *, K, dilation, pad, T_valid,
                   pre_slope, post_tanh):
    x = x_ref[0]                                   # (C_in, Tb) storage dtype
    if pre_slope is not None:
        x = _leaky(x, pre_slope)                   # leaky(0)==0 keeps zero tail
    Tb = x.shape[1]
    xp = _pad_lanes(x, pad, pad)
    xs = _stack_taps(xp, K, dilation, Tb)          # (K*C_in, Tb)
    y = jnp.dot(w_ref[...], xs, preferred_element_type=jnp.float32)
    y = y + b_ref[...]                             # f32 epilogue
    if post_tanh:
        y = jnp.tanh(y)
    lane = lax.broadcasted_iota(jnp.int32, y.shape, 1)
    y = jnp.where(lane < T_valid, y, 0.0)          # restore zero lane tail
    o_ref[0] = y.astype(o_ref.dtype)


def pallas_conv1d(x, w_flat, b, *, K, dilation, pad, T_valid,
                  pre_slope=None, post_tanh=False, out_dtype=None):
    B, C_in, Tb = x.shape
    C_out = w_flat.shape[0]
    assert dilation * (K - 1) == 2 * pad, "only 'same' convs are used here"
    out_dtype = out_dtype if out_dtype is not None else x.dtype
    kernel = functools.partial(
        _conv1d_kernel, K=K, dilation=dilation, pad=pad, T_valid=T_valid,
        pre_slope=pre_slope, post_tanh=post_tanh)
    n_elems = Tb * (2 * C_in + 2 * C_out + K * C_in) + C_out * K * C_in
    return pl.pallas_call(
        kernel,
        out_shape=jax.ShapeDtypeStruct((B, C_out, Tb), out_dtype),
        grid=(B,),
        in_specs=[
            pl.BlockSpec((1, C_in, Tb), lambda bb: (bb, 0, 0)),
            pl.BlockSpec((C_out, K * C_in), lambda bb: (0, 0)),
            pl.BlockSpec((C_out, 1), lambda bb: (0, 0)),
        ],
        out_specs=pl.BlockSpec((1, C_out, Tb), lambda bb: (bb, 0, 0)),
        compiler_params=pltpu.CompilerParams(
            dimension_semantics=("parallel",),
            vmem_limit_bytes=_vmem_limit(n_elems)),
    )(x, w_flat, b)


# ----------------------------------------------------------------------------
# Pallas kernel: polyphase ConvTranspose1d with fused pre-leaky_relu.
# Output is (B, stride, C_out, M); phases are interleaved on the host side
# with a cheap transpose+reshape (out[b,c,m*stride+r] = y[b,r,c,m]).
# ----------------------------------------------------------------------------
def _convtr_kernel(x_ref, *rest, groups, n_w, C_out, M, L, R, pre_slope,
                   T_valid_out, stride):
    w_refs = rest[:n_w]
    b_ref = rest[n_w]
    o_ref = rest[n_w + 1]
    x = _leaky(x_ref[0], pre_slope)                # (C_in, Tb_in); leaky(0)=0
    xp = _pad_lanes(x, L, R)
    lane = lax.broadcasted_iota(jnp.int32, (C_out, M), 1)
    bias = b_ref[...]
    wi = 0
    for g in groups:                               # static python
        Kr, c, phases = g['Kr'], g['c'], g['phases']
        if Kr > 0:
            start0 = c - Kr + 1 + L                # >= 0 by construction of L
            xs = jnp.concatenate(
                [xp[:, start0 + j:start0 + j + M] for j in range(Kr)], axis=0)
            y_all = jnp.dot(w_refs[wi][...], xs,
                            preferred_element_type=jnp.float32)
            wi += 1
        for pi, r in enumerate(phases):
            if Kr > 0:
                y = y_all[pi * C_out:(pi + 1) * C_out, :]
            else:
                y = jnp.zeros((C_out, M), jnp.float32)
            y = y + bias
            n_valid = _cdiv(T_valid_out - r, stride) if T_valid_out > r else 0
            y = jnp.where(lane < n_valid, y, 0.0)
            o_ref[0, r] = y.astype(o_ref.dtype)


def pallas_conv_transpose1d(x, up, *, T_valid_in, pre_slope):
    B, C_in, Tb_in = x.shape
    stride, K, padding = up['stride'], up['K'], up['padding']
    C_out = up['C_out']
    groups = up['groups']
    T_valid_out = (T_valid_in - 1) * stride - 2 * padding + K
    M = Tb_in
    if M * stride < T_valid_out:
        M = _round_up(_cdiv(T_valid_out, stride), LANE)
    L = max(max(0, g['Kr'] - 1 - g['c']) for g in groups)
    R = max(max(0, M - Tb_in + g['c']) for g in groups)
    n_w = len(up['w_groups'])
    kernel = functools.partial(
        _convtr_kernel, groups=groups, n_w=n_w, C_out=C_out, M=M, L=L, R=R,
        pre_slope=pre_slope, T_valid_out=T_valid_out, stride=stride)

    max_kr = max(g['Kr'] for g in groups)
    max_g = max(len(g['phases']) for g in groups)
    n_elems = (2 * C_in * Tb_in + 2 * stride * C_out * M
               + max_kr * C_in * M + max_g * C_out * M
               + sum(int(w.size) for w in up['w_groups']))

    in_specs = [pl.BlockSpec((1, C_in, Tb_in), lambda bb: (bb, 0, 0))]
    in_specs += [pl.BlockSpec(w.shape, lambda bb: (0, 0))
                 for w in up['w_groups']]
    in_specs += [pl.BlockSpec(up['b'].shape, lambda bb: (0, 0))]

    y = pl.pallas_call(
        kernel,
        out_shape=jax.ShapeDtypeStruct((B, stride, C_out, M), x.dtype),
        grid=(B,),
        in_specs=in_specs,
        out_specs=pl.BlockSpec((1, stride, C_out, M),
                               lambda bb: (bb, 0, 0, 0)),
        compiler_params=pltpu.CompilerParams(
            dimension_semantics=("parallel",),
            vmem_limit_bytes=_vmem_limit(n_elems)),
    )(x, *up['w_groups'], up['b'])
    # interleave phases on the time axis (trailing reshape is layout-free).
    out = jnp.transpose(y, (0, 2, 3, 1)).reshape(B, C_out, M * stride)
    return out, T_valid_out


# ----------------------------------------------------------------------------
# Pallas kernel: one full upsample-stage ResBlock group, fully fused
# (leaky_relu -> conv [-> leaky_relu -> conv] -> +residual, summed over
# resblocks and divided by num_kernels).  The (C, Tb) slab never leaves VMEM.
# ----------------------------------------------------------------------------
def _resgroup_kernel(x_ref, *rest, blocks, n_w, T_valid, num_kernels,
                     compute_dtype):
    w_refs = rest[:n_w]
    b_refs = rest[n_w:2 * n_w]
    o_ref = rest[2 * n_w]
    x0 = x_ref[0].astype(jnp.float32)              # residual path kept in f32
    C, Tb = x0.shape
    mask = lax.broadcasted_iota(jnp.int32, (C, Tb), 1) < T_valid

    def vconv(v, wi, K, dil, pad):
        vp = _pad_lanes(v.astype(compute_dtype), pad, pad)
        xs = _stack_taps(vp, K, dil, Tb)
        y = jnp.dot(w_refs[wi][...], xs, preferred_element_type=jnp.float32)
        y = y + b_refs[wi][...]
        return jnp.where(mask, y, 0.0)             # re-zero lane-padding tail

    xs_acc = None
    for rb in blocks:                              # static python: fully fused
        xb = x0
        for unit in rb:
            xt = vconv(_leaky(xb, LRELU_SLOPE), *unit[0])
            if len(unit) == 2:                     # ResBlock1 second conv
                xt = vconv(_leaky(xt, LRELU_SLOPE), *unit[1])
            xb = xt + xb
        xs_acc = xb if xs_acc is None else xs_acc + xb
    o_ref[0] = (xs_acc * (1.0 / num_kernels)).astype(o_ref.dtype)


def pallas_resblock_group(x, stage_params, *, T_valid, num_kernels):
    B, C, Tb = x.shape
    blocks_cfg, w_list, b_list = [], [], []
    max_K = 1
    for rb in stage_params:
        units = []
        for unit in rb['units']:
            ucfg = []
            for conv in unit:
                wi = len(w_list)
                w_list.append(conv['w_flat'])
                b_list.append(conv['b'])
                ucfg.append((wi, conv['K'], conv['dilation'], conv['padding']))
                max_K = max(max_K, conv['K'])
            units.append(tuple(ucfg))
        blocks_cfg.append(tuple(units))
    n_w = len(w_list)
    kernel = functools.partial(
        _resgroup_kernel, blocks=tuple(blocks_cfg), n_w=n_w, T_valid=T_valid,
        num_kernels=num_kernels, compute_dtype=x.dtype)

    n_elems = Tb * C * (6 + max_K) + sum(int(w.size) for w in w_list)
    in_specs = [pl.BlockSpec((1, C, Tb), lambda bb: (bb, 0, 0))]
    in_specs += [pl.BlockSpec(w.shape, lambda bb: (0, 0)) for w in w_list]
    in_specs += [pl.BlockSpec(bv.shape, lambda bb: (0, 0)) for bv in b_list]
    return pl.pallas_call(
        kernel,
        out_shape=jax.ShapeDtypeStruct((B, C, Tb), x.dtype),
        grid=(B,),
        in_specs=in_specs,
        out_specs=pl.BlockSpec((1, C, Tb), lambda bb: (bb, 0, 0)),
        compiler_params=pltpu.CompilerParams(
            dimension_semantics=("parallel",),
            vmem_limit_bytes=_vmem_limit(n_elems)),
    )(x, *w_list, *b_list)


# ----------------------------------------------------------------------------
# One-time parameter preparation (weight flattening / polyphase split).
# ----------------------------------------------------------------------------
def prepare_params(params, h, compute_dtype=jnp.float32):
    cdt = compute_dtype

    def flat_w(w):                      # (C_out, C_in, K) -> (C_out, K*C_in)
        C_out, C_in, K = (int(s) for s in w.shape)
        return jnp.transpose(w, (0, 2, 1)).reshape(C_out, K * C_in).astype(cdt)

    def col_b(b):
        return b.reshape(-1, 1).astype(jnp.float32)

    kp = {'compute_dtype': cdt,
          'num_kernels': len(h['resblock_kernel_sizes'])}

    w_pre = params['conv_pre_w']
    K_pre = int(w_pre.shape[2])
    kp['conv_pre'] = {'w': flat_w(w_pre), 'b': col_b(params['conv_pre_b']),
                      'K': K_pre, 'padding': get_padding(K_pre, 1)}

    # conv_post: pad C_out=1 to 8 sublane rows (sliced off in the wrapper).
    w_post = params['conv_post_w']
    C_out_p, C_in_p, K_p = (int(s) for s in w_post.shape)
    rows = _round_up(C_out_p, 8)
    w_post_p = jnp.zeros((rows, C_in_p, K_p), w_post.dtype).at[:C_out_p].set(w_post)
    b_post_p = jnp.zeros((rows,), jnp.float32).at[:C_out_p].set(
        params['conv_post_b'].astype(jnp.float32))
    kp['conv_post'] = {'w': flat_w(w_post_p), 'b': col_b(b_post_p),
                       'K': K_p, 'padding': get_padding(K_p, 1),
                       'true_cout': C_out_p}

    # Transposed convs: polyphase split, phases grouped by (taps, shift).
    kp['ups'] = []
    for i, (u, k) in enumerate(zip(h['upsample_rates'],
                                   h['upsample_kernel_sizes'])):
        p = (k - u + 1) // 2            # matches the PyTorch module spec
        w_t = params['ups'][i]['w']     # (C_in, C_out, K) torch layout
        C_in, C_out, K = (int(s) for s in w_t.shape)
        meta = []
        for r in range(u):
            rp = (r + p) % u
            c = (r + p) // u
            Kr = _cdiv(K - rp, u) if rp < K else 0
            meta.append((r, rp, c, Kr))
        grouped = {}
        for (r, rp, c, Kr) in meta:
            grouped.setdefault((Kr, c), []).append((r, rp))
        groups, w_groups = [], []
        for (Kr, c), plist in sorted(grouped.items()):
            phases = tuple(int(r) for (r, _) in plist)
            if Kr > 0:
                ws = []
                for (r, rp) in plist:
                    taps = [(Kr - 1 - j) * u + rp for j in range(Kr)]
                    sel = jnp.stack([w_t[:, :, t] for t in taps], axis=2)
                    ws.append(jnp.transpose(sel, (1, 2, 0)).reshape(
                        C_out, Kr * C_in))
                w_groups.append(jnp.concatenate(ws, axis=0).astype(cdt))
            groups.append({'Kr': int(Kr), 'c': int(c), 'phases': phases})
        kp['ups'].append({'stride': u, 'K': K, 'padding': p, 'C_out': C_out,
                          'groups': tuple(groups), 'w_groups': w_groups,
                          'b': col_b(params['ups'][i]['b'])})

    # ResBlocks grouped per upsample stage (one fused pallas_call per stage).
    kp['res_stages'] = []
    nk = kp['num_kernels']
    for i in range(len(h['upsample_rates'])):
        stage = []
        for j in range(nk):
            rb = params['resblocks'][i * nk + j]
            units = []
            if rb['type'] == '1':
                for c1, c2 in zip(rb['convs1'], rb['convs2']):
                    units.append([
                        {'w_flat': flat_w(c1['w']), 'b': col_b(c1['b']),
                         'K': int(c1['w'].shape[2]),
                         'dilation': c1['dilation'], 'padding': c1['padding']},
                        {'w_flat': flat_w(c2['w']), 'b': col_b(c2['b']),
                         'K': int(c2['w'].shape[2]),
                         'dilation': 1, 'padding': c2['padding']},
                    ])
            else:
                for c in rb['convs']:
                    units.append([
                        {'w_flat': flat_w(c['w']), 'b': col_b(c['b']),
                         'K': int(c['w'].shape[2]),
                         'dilation': c['dilation'], 'padding': c['padding']},
                    ])
            stage.append({'units': units})
        kp['res_stages'].append(stage)
    return kp


# ----------------------------------------------------------------------------
# Full forward pass (Pallas path).
# ----------------------------------------------------------------------------
def generators_forward_pallas(kp, h, x):
    B, C_mel, T = x.shape
    cdt = kp['compute_dtype']
    Tb = _round_up(T, LANE)
    Tv = T
    xb = jnp.zeros((B, C_mel, Tb), cdt).at[:, :, :T].set(x.astype(cdt))

    cp = kp['conv_pre']
    xb = pallas_conv1d(xb, cp['w'], cp['b'], K=cp['K'], dilation=1,
                       pad=cp['padding'], T_valid=Tv)

    for i in range(len(h['upsample_rates'])):
        xb, Tv = pallas_conv_transpose1d(xb, kp['ups'][i], T_valid_in=Tv,
                                         pre_slope=LRELU_SLOPE)
        xb = pallas_resblock_group(xb, kp['res_stages'][i], T_valid=Tv,
                                   num_kernels=kp['num_kernels'])

    cpo = kp['conv_post']
    # final F.leaky_relu uses the PyTorch default slope 0.01, then tanh.
    y = pallas_conv1d(xb, cpo['w'], cpo['b'], K=cpo['K'], dilation=1,
                      pad=cpo['padding'], T_valid=Tv,
                      pre_slope=0.01, post_tanh=True, out_dtype=jnp.float32)
    return y[:, :cpo['true_cout'], :Tv]


# ----------------------------------------------------------------------------
# Pure-JAX reference (lax.conv_general_dilated) used for correctness checks.
# ----------------------------------------------------------------------------
def ref_conv1d(x, w, b, *, dilation=1, padding=0,
               pre_act_slope=None, post_tanh=False):
    if pre_act_slope is not None:
        x = jnp.where(x >= 0, x, pre_act_slope * x)
    y = lax.conv_general_dilated(
        x, w, window_strides=(1,), padding=[(padding, padding)],
        rhs_dilation=(dilation,), dimension_numbers=('NCH', 'OIH', 'NCH'),
        precision=lax.Precision.HIGHEST)
    y = y + b.reshape(1, -1, 1)
    return jnp.tanh(y) if post_tanh else y


def ref_conv_transpose1d(x, w_t, b, *, stride, padding, pre_act_slope=None):
    if pre_act_slope is not None:
        x = jnp.where(x >= 0, x, pre_act_slope * x)
    K = w_t.shape[2]
    w_conv = jnp.flip(jnp.transpose(w_t, (1, 0, 2)), axis=2)
    y = lax.conv_general_dilated(
        x, w_conv, window_strides=(1,),
        padding=[(K - 1 - padding, K - 1 - padding)],
        lhs_dilation=(stride,), dimension_numbers=('NCH', 'OIH', 'NCH'),
        precision=lax.Precision.HIGHEST)
    return y + b.reshape(1, -1, 1)


def ref_resblock(rb, x):
    if rb['type'] == '1':
        for c1, c2 in zip(rb['convs1'], rb['convs2']):
            xt = ref_conv1d(x, c1['w'], c1['b'], dilation=c1['dilation'],
                            padding=c1['padding'], pre_act_slope=LRELU_SLOPE)
            xt = ref_conv1d(xt, c2['w'], c2['b'], dilation=1,
                            padding=c2['padding'], pre_act_slope=LRELU_SLOPE)
            x = xt + x
    else:
        for c in rb['convs']:
            xt = ref_conv1d(x, c['w'], c['b'], dilation=c['dilation'],
                            padding=c['padding'], pre_act_slope=LRELU_SLOPE)
            x = xt + x
    return x


def generators_forward_ref(params, h, x):
    num_kernels = len(h['resblock_kernel_sizes'])
    x = ref_conv1d(x, params['conv_pre_w'], params['conv_pre_b'], padding=3)
    for i, (u, k) in enumerate(zip(h['upsample_rates'],
                                   h['upsample_kernel_sizes'])):
        x = ref_conv_transpose1d(x, params['ups'][i]['w'],
                                 params['ups'][i]['b'],
                                 stride=u, padding=(k - u + 1) // 2,
                                 pre_act_slope=LRELU_SLOPE)
        xs = None
        for j in range(num_kernels):
            y = ref_resblock(params['resblocks'][i * num_kernels + j], x)
            xs = y if xs is None else xs + y
        x = xs / num_kernels
    x = ref_conv1d(x, params['conv_post_w'], params['conv_post_b'], padding=3,
                   pre_act_slope=0.01, post_tanh=True)
    return x


# ----------------------------------------------------------------------------
# Deterministic parameter init (weight_norm at init == the raw init weight).
# ----------------------------------------------------------------------------
def init_params(key, h):
    keys = iter(jax.random.split(key, 512))

    def w_init(shape):
        return 0.01 * jax.random.normal(next(keys), shape, jnp.float32)

    upc = h['upsample_initial_channel']
    params = {
        'conv_pre_w': w_init((upc, h['num_mels'], 7)),
        'conv_pre_b': w_init((upc,)),
        'ups': [],
        'resblocks': [],
    }
    for i, (u, k) in enumerate(zip(h['upsample_rates'],
                                   h['upsample_kernel_sizes'])):
        cin = upc // (2 ** i)
        cout = upc // (2 ** (i + 1))
        params['ups'].append({'w': w_init((cin, cout, k)),
                              'b': w_init((cout,))})
    ch = upc
    for i in range(len(h['upsample_rates'])):
        ch = upc // (2 ** (i + 1))
        for k, dils in zip(h['resblock_kernel_sizes'],
                           h['resblock_dilation_sizes']):
            if h['resblock'] == '1':
                convs1 = [{'w': w_init((ch, ch, k)), 'b': w_init((ch,)),
                           'dilation': d, 'padding': get_padding(k, d)}
                          for d in dils]
                convs2 = [{'w': w_init((ch, ch, k)), 'b': w_init((ch,)),
                           'padding': get_padding(k, 1)} for _ in dils]
                params['resblocks'].append({'type': '1',
                                            'convs1': convs1,
                                            'convs2': convs2})
            else:
                convs = [{'w': w_init((ch, ch, k)), 'b': w_init((ch,)),
                          'dilation': d, 'padding': get_padding(k, d)}
                         for d in dils]
                params['resblocks'].append({'type': '2', 'convs': convs})
    params['conv_post_w'] = w_init((1, ch, 7))
    params['conv_post_b'] = w_init((1,))
    return params


if __name__ == "__main__":
    h = {
        'resblock': '1',
        'resblock_kernel_sizes': [3, 5],
        'resblock_dilation_sizes': [[1, 3, 5], [1, 3, 5]],
        'upsample_rates': [2, 2],
        'upsample_kernel_sizes': [4, 4],
        'upsample_initial_channel': 32,
        'num_mels': 8,
    }
    key = jax.random.PRNGKey(0)
    pkey, xkey = jax.random.split(key)
    params = init_params(pkey, h)

    B, T = 2, 16
    x = jax.random.normal(xkey, (B, h['num_mels'], T), jnp.float32)

    ref = jax.block_until_ready(generators_forward_ref(params, h, x))

    # f32 Pallas path: exact check against the lax reference.
    kp32 = prepare_params(params, h, compute_dtype=jnp.float32)
    out = jax.block_until_ready(generators_forward_pallas(kp32, h, x))

    upp = 1
    for u in h['upsample_rates']:
        upp *= u
    assert out.shape == (B, 1, T * upp), out.shape
    assert jnp.allclose(out, ref, atol=1e-5, rtol=1e-4), \
        float(jnp.max(jnp.abs(out - ref)))

    # bf16 Pallas path (halves HBM traffic / VMEM on v6e & v7x): loose check.
    kp16 = prepare_params(params, h, compute_dtype=jnp.bfloat16)
    out16 = jax.block_until_ready(generators_forward_pallas(kp16, h, x))
    assert out16.shape == out.shape
    assert bool(jnp.all(jnp.isfinite(out16)))
    assert float(jnp.max(jnp.abs(out16.astype(jnp.float32) - ref))) < 5e-2

    print("KERNEL_OK")
</pallas_src>

<mosaic_0001>
module attributes {stable_mosaic.version = 11 : i64} {
  func.func @_conv1d_kernel(%arg0: i32, %arg1: memref<1x8x128xf32, #tpu.memory_space<vmem>>, %arg2: memref<32x56xf32, #tpu.memory_space<vmem>>, %arg3: memref<32x1xf32, #tpu.memory_space<vmem>>, %arg4: memref<1x32x128xf32, #tpu.memory_space<vmem>>) attributes {dimension_semantics = [#tpu.dimension_semantics<parallel>], iteration_bounds = array<i64: 2>, scalar_prefetch = 0 : i64, scratch_operands = 0 : i64, tpu.core_type = #tpu.core_type<tc>, window_params = [{transform_indices = @transform_0, window_bounds = array<i64: 1, 8, 128>}, {pipeline_mode = #tpu.pipeline_mode<synchronous>, transform_indices = @transform_1, window_bounds = array<i64: 32, 56>}, {pipeline_mode = #tpu.pipeline_mode<synchronous>, transform_indices = @transform_2, window_bounds = array<i64: 32, 1>}, {transform_indices = @transform_3, window_bounds = array<i64: 1, 32, 128>}]} {
    %c0 = arith.constant 0 : index
    %c0_0 = arith.constant 0 : index
    %c0_1 = arith.constant 0 : index
    %0 = vector.load %arg1[%c0, %c0_0, %c0_1] : memref<1x8x128xf32, #tpu.memory_space<vmem>>, vector<1x8x128xf32>
    %1 = vector.shape_cast %0 : vector<1x8x128xf32> to vector<8x128xf32>
    %cst = arith.constant 0.000000e+00 : f32
    %2 = vector.broadcast %cst : f32 to vector<8x3xf32>
    %cst_2 = arith.constant 0.000000e+00 : f32
    %3 = vector.broadcast %cst_2 : f32 to vector<8x3xf32>
    %4 = tpu.concatenate %2, %1, %3 in 1 : vector<8x3xf32>, vector<8x128xf32>, vector<8x3xf32> -> vector<8x134xf32>
    %5 = vector.extract_strided_slice %4 {offsets = [0, 0], sizes = [8, 128], strides = [1, 1]} : vector<8x134xf32> to vector<8x128xf32>
    %6 = vector.extract_strided_slice %4 {offsets = [0, 1], sizes = [8, 128], strides = [1, 1]} : vector<8x134xf32> to vector<8x128xf32>
    %7 = vector.extract_strided_slice %4 {offsets = [0, 2], sizes = [8, 128], strides = [1, 1]} : vector<8x134xf32> to vector<8x128xf32>
    %8 = vector.extract_strided_slice %4 {offsets = [0, 3], sizes = [8, 128], strides = [1, 1]} : vector<8x134xf32> to vector<8x128xf32>
    %9 = vector.extract_strided_slice %4 {offsets = [0, 4], sizes = [8, 128], strides = [1, 1]} : vector<8x134xf32> to vector<8x128xf32>
    %10 = vector.extract_strided_slice %4 {offsets = [0, 5], sizes = [8, 128], strides = [1, 1]} : vector<8x134xf32> to vector<8x128xf32>
    %11 = vector.extract_strided_slice %4 {offsets = [0, 6], sizes = [8, 128], strides = [1, 1]} : vector<8x134xf32> to vector<8x128xf32>
    %12 = tpu.concatenate %5, %6, %7, %8, %9, %10, %11 in 0 : vector<8x128xf32>, vector<8x128xf32>, vector<8x128xf32>, vector<8x128xf32>, vector<8x128xf32>, vector<8x128xf32>, vector<8x128xf32> -> vector<56x128xf32>
    %c0_3 = arith.constant 0 : index
    %c0_4 = arith.constant 0 : index
    %13 = vector.load %arg2[%c0_3, %c0_4] : memref<32x56xf32, #tpu.memory_space<vmem>>, vector<32x56xf32>
    %cst_5 = arith.constant dense<0.000000e+00> : vector<32x128xf32>
    %14 = tpu.matmul %13, %12, %cst_5 {dimension_numbers = #tpu.dot_dimension_numbers<[1], [0], [0], [1], [0, 0, 1, 1], [], []>} : vector<32x56xf32>, vector<56x128xf32>, vector<32x128xf32> -> vector<32x128xf32>
    %c0_6 = arith.constant 0 : index
    %c0_7 = arith.constant 0 : index
    %15 = vector.load %arg3[%c0_6, %c0_7] : memref<32x1xf32, #tpu.memory_space<vmem>>, vector<32x1xf32>
    %16 = vector.broadcast %15 : vector<32x1xf32> to vector<32x128xf32>
    %17 = arith.addf %14, %16 : vector<32x128xf32>
    %18 = tpu.iota {dimensions = array<i32: 1>} : vector<32x128xi32>
    %c16_i32 = arith.constant 16 : i32
    %19 = vector.broadcast %c16_i32 : i32 to vector<32x128xi32>
    %20 = arith.cmpi slt, %18, %19 : vector<32x128xi32>
    %cst_8 = arith.constant 0.000000e+00 : f32
    %21 = vector.broadcast %cst_8 : f32 to vector<32x128xf32>
    %22 = arith.select %20, %17, %21 : vector<32x128xi1>, vector<32x128xf32>
    %c0_9 = arith.constant 0 : index
    %c0_10 = arith.constant 0 : index
    %c0_11 = arith.constant 0 : index
    %23 = vector.load %arg4[%c0_9, %c0_10, %c0_11] : memref<1x32x128xf32, #tpu.memory_space<vmem>>, vector<1x32x128xf32>
    %24 = vector.shape_cast %23 : vector<1x32x128xf32> to vector<32x128xf32>
    %25 = vector.shape_cast %22 : vector<32x128xf32> to vector<1x32x128xf32>
    tpu.vector_store %arg4[%c0_9, %c0_10, %c0_11], %25 {strides = array<i32>} : memref<1x32x128xf32, #tpu.memory_space<vmem>>, vector<1x32x128xf32>,
    return
  }
  func.func @transform_0(%arg0: i32) -> (i32, i32, i32) {
    %c0_i32 = arith.constant 0 : i32
    %c0_i32_0 = arith.constant 0 : i32
    %c0_i32_1 = arith.constant 0 : i32
    return %arg0, %c0_i32, %c0_i32_0 : i32, i32, i32
  }
  func.func @transform_1(%arg0: i32) -> (i32, i32) {
    %c0_i32 = arith.constant 0 : i32
    %c0_i32_0 = arith.constant 0 : i32
    %c0_i32_1 = arith.constant 0 : i32
    return %c0_i32, %c0_i32_0 : i32, i32
  }
  func.func @transform_2(%arg0: i32) -> (i32, i32) {
    %c0_i32 = arith.constant 0 : i32
    %c0_i32_0 = arith.constant 0 : i32
    %c0_i32_1 = arith.constant 0 : i32
    return %c0_i32, %c0_i32_0 : i32, i32
  }
  func.func @transform_3(%arg0: i32) -> (i32, i32, i32) {
    %c0_i32 = arith.constant 0 : i32
    %c0_i32_0 = arith.constant 0 : i32
    %c0_i32_1 = arith.constant 0 : i32
    return %arg0, %c0_i32, %c0_i32_0 : i32, i32, i32
  }
}

</mosaic_0001>

<bundles_post_ra>
// kernel: tpu_custom_call.1
= control target key start
LH: loop header
LB: loop body
LE: loop exit
PB: predicated region body
PF: predicated region fallthrough
CT: control target
= control target key end

     0   :  { %8 = vsyncpa [#allocation3], 0  ;;  %s906_s0 = inlined_call_operand.hbm [shape: f32[2,8,128], index: 0, kind: input, shape index: {}]   ;;  %s907_s1 = inlined_call_operand.vmem [shape: f32[32,56], index: 1, kind: input, shape index: {}]   ;;  %s908_s2 = inlined_call_operand.vmem [shape: f32[32,1], index: 2, kind: input, shape index: {}]   ;;  %s909_s3 = inlined_call_operand.hbm [shape: f32[2,32,128], index: 3, kind: output, shape index: {}]  }
   0x1   :  { %10 = vsyncpa [#allocation3 + $0x1], 0 }
   0x2   :  { %11 = vsyncpa [#allocation4], 0 }
   0x3   :  { %13 = vsyncpa [#allocation4 + $0x1], 0  ;;  %s711_s12 = smov 0   ;;  %s713_s13 = smov 0  }
   0x4   :  { %s715_s14 = smov 0   ;;  %s717_s15 = smov 0  }
   0x5 LB: > { %s732_s16 = sadd.s32 4294967295, %s677_s15   ;;  %s462_s17 = sadd.s32 4294967294, %s677_s15   ;;  %s677_s15 = sphi %s717_s15, %s926_s15   ;;  %s673_s14 = sphi %s715_s14, %s925_s14   ;;  %s669_s13 = sphi %s713_s13, %s924_s13   ;;  %s665_s12 = sphi %s711_s12, %s923_s12  }
   0x6   : > { %s736_s18 = sadd.s32 1, %s677_s15   ;;  %s26_s19 = sadd.s32 1, %s673_s14 }
   0x7   : > { %s23_s20 = ssub.s32 %s677_s15, %s736_s18  ;;  %p33_p0 = scmp.ne.s32.totalorder %s673_s14, %s669_s13 }
   0x8   : > { %p24_p1 = scmp.eq.s32.totalorder %s23_s20, 0  ;;  %p34_p2 = scmp.eq.s32.totalorder %s677_s15, 0 }
   0x9   : > { %p39_p3 = scmp.ne.s32.totalorder %s669_s13, %s665_s12  ;;  %p40_p4 = scmp.eq.s32.totalorder %s732_s16, 0 }
   0xa   : > { %s748_s21 = scalar_select %p24_p1, %s673_s14, %s26_s19  }
   0xb   : > { %p750_p5 = por %p34_p2, %p33_p0  ;;  %p754_p6 = por %p40_p4, %p39_p3 }
   0xc   : > { %p105_p7 = scmp.eq.s32.totalorder %s732_s16, 1  ;;  %p111_p8 = scmp.eq.s32.totalorder %s462_s17, 1 }
   0xd   : > { %s913_s23 = scalar_select %p754_p6, 1, 0 }
   0xe   : > { %p539_p10 = scmp.lt.s32.totalorder %s677_s15, 2  ;;  %p761_p11 = por %p105_p7, %p33_p0 }
   0xf   : > { %p765_p12 = por %p111_p8, %p39_p3  ;;  %s137_s26 = sand.u32 1, %s673_s14  }
  0x10   : > { %s914_s24 = scalar_select %p761_p11, 1, 0 }
  0x11   : > { %s915_s25 = scalar_select %p765_p12, 1, 0 }
  0x12   : > { %s466_s27 = sshll.u32 %s677_s15, 7  ;;  %s465_s28 = sshll.u32 %s137_s26, 3 }
  0x13   : > { %s774_s4 = scalar_lea.hbm %s906_s0, %s466_s27  ;;  %s141_s5 = scalar_lea.vmem [#allocation2], %s465_s28 }
  0x14   : > { %s148_s6 = sshll.u32 %s141_s5, 4  ;;  %p778_p13 = pnand %p539_p10, %p750_p5  ;;  %s782_s6 = int_to_ptr.vmem [resolvable:$true] %s148_s6 }
  0x15   : > { %s138_s8 = scalar_lea.sflag [#allocation3], %s137_s26  ;;  %s585_s9 = scalar_lea.hbm %s774_s4, 128 }
  0x16   : > { %p586_p2 = scmp.ne.s32.totalorder %s774_s4, %s585_s9  ;;  %p587_p3 = pneg %p778_p13 }
  0x17   : > { %s590_s17 = scalar_lea.hbm %s906_s0, 256  ;;  %p591_p5 = scmp.lt.s32.totalorder %s774_s4, %s906_s0 }
  0x18   : > { %p588_p4 = pnand %p587_p3, %p586_p2  ;;  %p592_p8 = scmp.lt.s32.totalorder %s590_s17, %s585_s9 }
  0x1a   : > { %p589_p7 = pneg %p588_p4  ;;  %p593_p10 = por %p592_p8, %p591_p5 }
  0x1c   : > { %p594_p9 = pnand %p593_p10, %p589_p7 }
  0x1e   : > { %597 = shalt.err (!%p594_p9)
}
  0x1f   : > { %s598_s22 = scalar_lea.vmem %s782_s6, 128  ;;  %s679_s26 = smov [#allocation2]  }
  0x20   : > { %p599_p0 = scmp.ne.s32.totalorder %s782_s6, %s598_s22  ;;  %s603_s27 = sshll.u32 %s679_s26, 4  ;;  %s604_s27 = int_to_ptr.vmem [resolvable:$false] %s603_s27 }
  0x21   : > { %s605_s28 = scalar_lea.vmem %s604_s27, 256  ;;  %p606_p4 = scmp.lt.s32.totalorder %s782_s6, %s604_s27 }
  0x22   : > { %p601_p1 = pnand %p599_p0, %p587_p3  ;;  %p607_p12 = scmp.lt.s32.totalorder %s605_s28, %s598_s22 }
  0x24   : > { %p602_p2 = pneg %p601_p1  ;;  %p608_p11 = por %p607_p12, %p606_p4 }
  0x26   : > { %p609_p6 = pnand %p608_p11, %p602_p2 }
  0x28   : > { %612 = shalt.err (!%p609_p6)
}
  0x29   : > { %534 = dma.hbm_to_vmem [thread:$0]  (!%p778_p13), %s774_s4, 128, %s782_s6, %s138_s8  }
  0x2a   : > { %p917_p9 = scmp.lt.s32.totalorder %s677_s15, 3  ;;  %p918_p7 = scmp.ge.s32.totalorder %s677_s15, 1 }
  0x2c   : > { %p154_p0 = pnand %p918_p7, %p917_p9 }
  0x2d   : > { %s809_s29 = sand.u32 (!%p154_p0), 1, %s669_s13   ;;  %p919_p6 = scmp.ne.s32.totalorder (!%p154_p0), %s913_s23, 0 }
  0x2e   : > { %157 = sbr.rel (%p154_p0) target bundleno = 521 (0x209), region = 32  ;;  %s468_s30 = sshll.u32 (!%p154_p0), %s809_s29, 3 }
  0x2f   : > { %s160_s5 = scalar_lea.sflag (!%p154_p0), [#allocation3], %s809_s29  ;;  %s163_s9 = scalar_lea.vmem (!%p154_p0), [#allocation2], %s468_s30 }
  0x33   : > { %656 = dma.done.wait (%p919_p6), %s160_s5, 128  }
  0x34   : > { %658 = vsyncadd (%p919_p6), %s160_s5, 4294967168  ;;  %v186_v0 = vld [vmem:[%s163_s9] sm:$0xff]  ;;  %s680_s4 = smov 3   ;;  %vm191_vm0 = vcmask 23552   ;;  %s681_s6 = smov 122   ;;  %vm266_vm1 = vcmask 457728   ;;  %v364_v32 = vlaneseq }
  0x35   : > { %188 = vrot.lane.b32.xlu0 %v186_v0, %s680_s4  ;;  %s682_s7 = smov 123   ;;  %s683_s23 = smov 124   ;;  %v238_v4 = vld [vmem:[%s907_s1] sm:$0xff]  ;;  %v240_v5 = vld [vmem:[%s907_s1 + $0x10] sm:$0xff]  ;;  %v685_v6 = vmov 0   ;;  %v243_v8 = vld [vmem:[%s908_s2 + $0x8] sm:$0xff] }
  0x36   : > { %507 = vmatprep.mubr.msk.f32.mxu0 %vm266_vm1, %v238_v4  ;;  %510 = vmatprep.mubr.msk.f32.mxu1 %vm266_vm1, %v240_v5  ;;  %s684_s19 = smov 125   ;;  %s686_s20 = smov 126   ;;  %v242_v7 = vld [vmem:[%s908_s2] sm:$0xff]  ;;  %v244_v9 = vld [vmem:[%s908_s2 + $0x10] sm:$0xff]  ;;  %v245_v10 = vld [vmem:[%s908_s2 + $0x18] sm:$0xff]  ;;  %vm235_vm2 = vcmask 998400  }
  0x37   : > { %583 = vset.pattern.permute.xlu1 %v685_v6  ;;  %584 = vset.pattern.permute.xlu0 %v685_v6  ;;  %s687_s22 = smov 127   ;;  %vm228_vm3 = vcmask 1006592   ;;  %vm221_vm4 = vcmask 1014784   ;;  %vm214_vm5 = vcmask 1022976   ;;  %vm207_vm6 = vcmask 1031168   ;;  %vm470_vm8 = vmneg %vm191_vm0  ;;  %v239_v29 = vld [vmem:[%s907_s1 + $0x8] sm:$0xff] }
  0x38   : > { %vm200_vm7 = vcmask 1039360   ;;  %v241_v30 = vld [vmem:[%s907_s1 + $0x18] sm:$0xff]  ;;  %s469_s11 = sshll.u32 %s809_s29, 5  ;;  %v365_v34 = vand.u32 127, %v364_v32  ;;  %p920_p12 = scmp.ne.s32.totalorder %s914_s24, 0 }
  0x39   : > { %s185_s17 = scalar_lea.vmem [#allocation5], %s469_s11  ;;  %s688_s30 = smov [#allocation5]  }
  0x3a   : > { %vm366_vm9 = vcmp.lt.s32.totalorder %v365_v34, 16  ;;  %s617_s5 = sshll.u32 %s688_s30, 4  ;;  %s618_s5 = int_to_ptr.vmem [resolvable:$false] %s617_s5 }
  0x3b   : > { %s619_s9 = scalar_lea.vmem %s618_s5, 1024 }
  0xa7   : > { %v817_v1 = vpop.permute.xlu0 %188 }
  0xa8   : > { %v193_v2 = vsel %vm191_vm0, %v817_v1, 0.0  ;;  %v192_v3 = vsel %vm191_vm0, 0.0, %v817_v1 }
  0xa9   : > { %233 = vrot.lane.b32.xlu1 %v193_v2, %s681_s6  ;;  %231 = vrot.lane.b32.xlu0 %v192_v3, %s681_s6 }
  0xad   : > { %224 = vrot.lane.b32.xlu1 %v192_v3, %s682_s7  ;;  %226 = vrot.lane.b32.xlu0 %v193_v2, %s682_s7 }
  0xb1   : > { %217 = vrot.lane.b32.xlu1 %v192_v3, %s683_s23  ;;  %219 = vrot.lane.b32.xlu0 %v193_v2, %s683_s23 }
  0xb5   : > { %210 = vrot.lane.b32.xlu1 %v192_v3, %s684_s19  ;;  %212 = vrot.lane.b32.xlu0 %v193_v2, %s684_s19  ;;  %s389_s19 = sshll.u32 %s185_s17, 4  ;;  %s858_s19 = int_to_ptr.vmem [resolvable:$true] %s389_s19 }
  0xb6   : > { %s613_s28 = scalar_lea.vmem %s858_s19, 512  ;;  %p620_p3 = scmp.lt.s32.totalorder %s858_s19, %s618_s5 }
  0xb7   : > { %p614_p11 = scmp.ne.s32.totalorder %s858_s19, %s613_s28  ;;  %p621_p5 = scmp.lt.s32.totalorder %s619_s9, %s613_s28 }
  0xb9   : > { %203 = vrot.lane.b32.xlu1 %v192_v3, %s686_s20  ;;  %205 = vrot.lane.b32.xlu0 %v193_v2, %s686_s20  ;;  %s481_s20 = sshll.u32 %s732_s16, 9  ;;  %s376_s16 = scalar_lea.sflag [#allocation4], %s809_s29 }
  0xba   : > { %s863_s27 = scalar_lea.hbm %s909_s3, %s481_s20  ;;  %p615_p13 = pnand %p614_p11, %p920_p12 }
  0xbb   : > { %p622_p8 = por %p621_p5, %p620_p3 }
  0xbc   : > { %p616_p1 = pneg %p615_p13 }
  0xbd   : > { %196 = vrot.lane.b32.xlu1 %v192_v3, %s687_s22  ;;  %198 = vrot.lane.b32.xlu0 %v193_v2, %s687_s22 }
  0xbe   : > { %p623_p10 = pnand %p622_p8, %p616_p1 }
  0xc1   : > { %248 = vperm.xlu1 %583, %v242_v7   ;;  %253 = vperm.xlu0 %584, %v243_v8  }
  0xc5   : > { %258 = vperm.xlu1 %583, %v244_v9  }
  0xc9   : > { %263 = vperm.xlu1 %583, %v245_v10  }
 0x11b   : > { %v234_v11 = vpop.permute.xlu1 %233  ;;  %v232_v12 = vpop.permute.xlu0 %231 }
 0x11c   : > { %v236_v13 = vsel %vm235_vm2, %v232_v12, %v234_v11 }
 0x11d   : > { %493 = vmatprep.subr.mxu0 %v236_v13  ;;  %513 = vmatprep.subr.mxu1 %v236_v13 }
 0x11e   : > { %494 = vmatpush3.msra.mxu0 %v236_v13  ;;  %520 = vmatpush3.msra.mxu1 %v236_v13 }
 0x11f   : > { %v225_v14 = vpop.permute.xlu1 %224  ;;  %v227_v15 = vpop.permute.xlu0 %226 }
 0x120   : > { %v229_v16 = vsel %vm228_vm3, %v225_v14, %v227_v15 }
 0x121   : > { %495 = vmatprep.subr.mxu0 %v229_v16  ;;  %514 = vmatprep.subr.mxu1 %v229_v16 }
 0x122   : > { %496 = vmatpush3.msra.mxu0 %v229_v16  ;;  %521 = vmatpush3.msra.mxu1 %v229_v16 }
 0x123   : > { %v218_v17 = vpop.permute.xlu1 %217  ;;  %v220_v18 = vpop.permute.xlu0 %219 }
 0x124   : > { %v222_v19 = vsel %vm221_vm4, %v218_v17, %v220_v18 }
 0x125   : > { %497 = vmatprep.subr.mxu0 %v222_v19  ;;  %515 = vmatprep.subr.mxu1 %v222_v19 }
 0x126   : > { %498 = vmatpush3.msra.mxu0 %v222_v19  ;;  %522 = vmatpush3.msra.mxu1 %v222_v19 }
 0x127   : > { %v211_v20 = vpop.permute.xlu1 %210  ;;  %v213_v21 = vpop.permute.xlu0 %212 }
 0x128   : > { %v215_v22 = vsel %vm214_vm5, %v211_v20, %v213_v21 }
 0x129   : > { %499 = vmatprep.subr.mxu0 %v215_v22  ;;  %516 = vmatprep.subr.mxu1 %v215_v22 }
 0x12a   : > { %500 = vmatpush3.msra.mxu0 %v215_v22  ;;  %523 = vmatpush3.msra.mxu1 %v215_v22 }
 0x12b   : > { %v204_v23 = vpop.permute.xlu1 %203  ;;  %v206_v24 = vpop.permute.xlu0 %205 }
 0x12c   : > { %v208_v25 = vsel %vm207_vm6, %v204_v23, %v206_v24 }
 0x12d   : > { %501 = vmatprep.subr.mxu0 %v208_v25  ;;  %517 = vmatprep.subr.mxu1 %v208_v25 }
 0x12e   : > { %502 = vmatpush3.msra.mxu0 %v208_v25  ;;  %524 = vmatpush3.msra.mxu1 %v208_v25 }
 0x12f   : > { %v197_v26 = vpop.permute.xlu1 %196  ;;  %v199_v27 = vpop.permute.xlu0 %198 }
 0x130   : > { %v201_v28 = vsel %vm200_vm7, %v197_v26, %v199_v27 }
 0x131   : > { %503 = vmatprep.subr.mxu0 %v201_v28  ;;  %518 = vmatprep.subr.mxu1 %v201_v28 }
 0x132   : > { %504 = vmatpush3.msra.mxu0 %v201_v28  ;;  %525 = vmatpush3.msra.mxu1 %v201_v28 }
 0x133   : > { %505 = vmatprep.subr.msk.mxu0 %vm470_vm8, %v817_v1  ;;  %519 = vmatprep.subr.msk.mxu1 %vm470_vm8, %v817_v1 }
 0x134   : > { %506 = vmatpush3.msk.msra.mxu0 %vm470_vm8, %v817_v1  ;;  %526 = vmatpush3.msk.msra.mxu1 %vm470_vm8, %v817_v1 }
 0x135   : > { %508 = vmatmul.mubr.msk.f32.vlgmr.msra.gmra.mxu0 %vm266_vm1, %v239_v29  ;;  %511 = vmatmul.mubr.msk.f32.vlgmr.msra.gmra.mxu1 %vm266_vm1, %v241_v30 }
 0x13c   : > { %v249_v31 = vpop.permute.xlu1 %248  ;;  %v254_v35 = vpop.permute.xlu0 %253 }
 0x140   : > { %v259_v33 = vpop.permute.xlu1 %258 }
 0x144   : > { %v264_v36 = vpop.permute.xlu1 %263 }
 0x1f5   : > { %v509_v37 = vpop.f32.mrf.mxu0  ;;  %v512_v38 = vpop.f32.mrf.mxu1 }
 0x1f6   : > { %v361_v39 = vadd.f32 %v512_v38, %v264_v36  ;;  %v351_v40 = vadd.f32 %v509_v37, %v254_v35 }
 0x1f7   : > { %v345_v41 = vpop.f32.mrf.mxu0  ;;  %v355_v42 = vpop.f32.mrf.mxu1 }
 0x1f8   : > { %v370_v43 = vsel %vm366_vm9, %v361_v39, 0.0  ;;  %v368_v44 = vsel %vm366_vm9, %v351_v40, 0.0  ;;  %v346_v45 = vadd.f32 %v345_v41, %v249_v31  ;;  %v356_v46 = vadd.f32 %v355_v42, %v259_v33 }
 0x1f9   : > { %374 = vst [vmem:[%s185_s17 + $0x18] sm:$0xff] %v370_v43  ;;  %372 = vst [vmem:[%s185_s17 + $0x8] sm:$0xff] %v368_v44 }
 0x1fa   : > { %v367_v47 = vsel %vm366_vm9, %v346_v45, 0.0  ;;  %v369_v48 = vsel %vm366_vm9, %v356_v46, 0.0 }
 0x1fb   : > { %371 = vst [vmem:[%s185_s17] sm:$0xff] %v367_v47  ;;  %373 = vst [vmem:[%s185_s17 + $0x10] sm:$0xff] %v369_v48 }
 0x1fc   : > { %626 = shalt.err (!%p623_p10)
}
 0x1fd   : > { %s627_s4 = scalar_lea.hbm %s863_s27, 512  ;;  %s631_s23 = scalar_lea.hbm %s909_s3, 1024 }
 0x1fe   : > { %p628_p2 = scmp.ne.s32.totalorder %s863_s27, %s627_s4  ;;  %p632_p7 = scmp.lt.s32.totalorder %s863_s27, %s909_s3 }
 0x1ff   : > { %p633_p0 = scmp.lt.s32.totalorder %s631_s23, %s627_s4 }
 0x200   : > { %p629_p4 = pnand %p628_p2, %p920_p12 }
 0x201   : > { %p634_p6 = por %p633_p0, %p632_p7 }
 0x202   : > { %p630_p9 = pneg %p629_p4 }
 0x204   : > { %p635_p11 = pnand %p634_p6, %p630_p9 }
 0x206   : > { %638 = shalt.err (!%p635_p11)
}
 0x207   : > { %s689_s11 = smov 128   ;;  %s690_s17 = smov 8  }
 0x208   : > { %529 = dma.vmem_to_hbm [thread:$0]  (%p920_p12), %s858_s19, 512, %s863_s27, %s376_s16, %s689_s11, %s689_s11, %s690_s17  }
 0x209 PF: > { %s404_s20 = sand.u32 1, %s665_s12   ;;  %p921_p13 = scmp.ne.s32.totalorder %s915_s25, 0 }
 0x20a   : > { %p922_p1 = scmp.ge.s32.totalorder %s677_s15, 2  ;;  %s405_s22 = scalar_lea.sflag [#allocation4], %s404_s20 }
 0x20c   : > { %p536_p3 = pnand %p922_p1, %p921_p13 }
 0x20e   : > { %p537_p5 = pneg %p536_p3 }
 0x210   : > { %660 = dma.done.wait (%p537_p5), %s405_s22, 512  }
 0x211   : > { %662 = vsyncadd (%p537_p5), %s405_s22, 4294966784  ;;  %p16_p8 = scmp.ge.s32.totalorder %s736_s18, 4   ;;  %s923_s12 = smov %s669_s13 }
 0x212   : > { %s924_s13 = smov %s673_s14  ;;  %s925_s14 = smov %s748_s21 }
 0x213   : > { %s926_s15 = smov %s736_s18  ;;  %18 = sbr.rel (!%p16_p8) target bundleno = 5 (0x5), region = 77 }
 0x218   :  { %410 = vsyncpa [#allocation3], 1 }
 0x219   :  { %412 = vsyncpa [#allocation3 + $0x1], 1 }
 0x21a   :  { %413 = vsyncpa [#allocation4], 1 }
 0x21b   :  { %415 = vsyncpa [#allocation4 + $0x1], 1 }

</bundles_post_ra>
